<compile_context>
chip_gen: v6e
topology: v6e:2x2x1
jax: 0.10.0
libtpu: 0.0.40
codegen_flags: <defaults>
</compile_context>

<pallas_src>
import jax
import jax.numpy as jnp
from jax import lax
from jax.experimental import pallas as pl
from jax.experimental.pallas import tpu as pltpu

_BATCH_BLOCK = 1024  # rows per output block when the batch axis is gridded


def const_model_kernel(p_ref, out_ref):
    # p_ref: SMEM f32[3] = [d0, d1, magnitude]; out_ref: VMEM f32[TB, 2].
    d0 = p_ref[0]
    d1 = p_ref[1]
    mag = p_ref[2]

    # scale = tanh(mag) * rsqrt(d0^2 + d1^2): scalar-unit mul/add feeding
    # EUP rsqrt/tanh (no VPU divide, no vector reduce).
    scale = lax.rsqrt(d0 * d0 + d1 * d1) * jnp.tanh(mag)
    v0 = d0 * scale
    v1 = d1 * scale

    # Broadcast the two scalars across the batch rows of this block:
    # column 0 <- v0, column 1 <- v1.  Pure VPU select + store.
    col = lax.broadcasted_iota(jnp.int32, out_ref.shape, dimension=1)
    out_ref[...] = jnp.where(col == 0, v0, v1)


def _batch_block(batch: int) -> int:
    # Grid the batch axis only when it is large and tiles cleanly; otherwise a
    # single full block (block shape == array shape is always legal).
    if batch >= 2 * _BATCH_BLOCK and batch % _BATCH_BLOCK == 0:
        return _BATCH_BLOCK
    return batch


def pack_params(direction, magnitude):
    """One-time parameter prep (hoisted out of the per-call path): f32[3]."""
    return jnp.concatenate(
        [
            jnp.asarray(direction, jnp.float32).reshape(-1),  # (2,)
            jnp.asarray(magnitude, jnp.float32).reshape(-1),  # (1,)
        ]
    )


def const_model_forward(x, packed_params):
    """x: any array whose leading dim is the batch. Returns (B, 2) f32."""
    batch = x.shape[0]
    tb = _batch_block(batch)
    return pl.pallas_call(
        const_model_kernel,
        out_shape=jax.ShapeDtypeStruct((batch, 2), jnp.float32),
        grid=(batch // tb,),
        in_specs=[
            # Packed [d0, d1, mag] scalars live in SMEM, read on the scalar path.
            pl.BlockSpec(memory_space=pltpu.MemorySpace.SMEM),
        ],
        out_specs=pl.BlockSpec((tb, 2), lambda i: (i, 0)),
        compiler_params=pltpu.CompilerParams(
            dimension_semantics=("parallel",)
        ),
    )(packed_params)


if __name__ == "__main__":
    key = jax.random.PRNGKey(0)
    k_dir, k_mag, k_x = jax.random.split(key, 3)

    # Deterministic "randn"-style parameter init (matches module shapes).
    direction = jax.random.normal(k_dir, (1, 2), dtype=jnp.float32)
    magnitude = jax.random.normal(k_mag, (1,), dtype=jnp.float32)

    # Example input: NCHW; only the batch dim matters for the forward pass.
    x = jax.random.normal(k_x, (2, 4, 16, 16), dtype=jnp.float32)

    # Parameter packing is done once (init-time), not per call.
    params = pack_params(direction, magnitude)

    out = jax.block_until_ready(const_model_forward(x, params))

    # Pure-JAX reference check (matches PyTorch: Frobenius norm, no eps guard).
    ref = (direction / jnp.linalg.norm(direction)) * jnp.tanh(magnitude[0])
    ref = jnp.broadcast_to(ref, (x.shape[0], 2))
    assert out.shape == (x.shape[0], 2)
    assert jnp.allclose(out, ref, atol=1e-5, rtol=1e-5)

    print("KERNEL_OK")
</pallas_src>

<mosaic_0001>
module attributes {stable_mosaic.version = 11 : i64} {
  func.func @const_model_kernel(%arg0: i32, %arg1: memref<3xf32, #tpu.memory_space<smem>>, %arg2: memref<2x2xf32, #tpu.memory_space<vmem>>) attributes {dimension_semantics = [#tpu.dimension_semantics<parallel>], iteration_bounds = array<i64: 1>, scalar_prefetch = 0 : i64, scratch_operands = 0 : i64, tpu.core_type = #tpu.core_type<tc>, window_params = [{transform_indices = @transform_0, window_bounds = array<i64: 3>}, {transform_indices = @transform_1, window_bounds = array<i64: 2, 2>}]} {
    %c0 = arith.constant 0 : index
    %0 = memref.load %arg1[%c0] : memref<3xf32, #tpu.memory_space<smem>>
    %c1 = arith.constant 1 : index
    %1 = memref.load %arg1[%c1] : memref<3xf32, #tpu.memory_space<smem>>
    %c2 = arith.constant 2 : index
    %2 = memref.load %arg1[%c2] : memref<3xf32, #tpu.memory_space<smem>>
    %3 = arith.mulf %0, %0 : f32
    %4 = arith.mulf %1, %1 : f32
    %5 = arith.addf %3, %4 : f32
    %6 = math.rsqrt %5 : f32
    %7 = math.tanh %2 : f32
    %8 = arith.mulf %6, %7 : f32
    %9 = arith.mulf %0, %8 : f32
    %10 = arith.mulf %1, %8 : f32
    %11 = tpu.iota {dimensions = array<i32: 1>} : vector<2x2xi32>
    %c0_i32 = arith.constant 0 : i32
    %12 = vector.broadcast %c0_i32 : i32 to vector<2x2xi32>
    %13 = arith.cmpi eq, %11, %12 : vector<2x2xi32>
    %14 = vector.broadcast %9 : f32 to vector<2x2xf32>
    %15 = vector.broadcast %10 : f32 to vector<2x2xf32>
    %16 = arith.select %13, %14, %15 : vector<2x2xi1>, vector<2x2xf32>
    %c0_0 = arith.constant 0 : index
    %c0_1 = arith.constant 0 : index
    %17 = vector.load %arg2[%c0_0, %c0_1] : memref<2x2xf32, #tpu.memory_space<vmem>>, vector<2x2xf32>
    tpu.vector_store %arg2[%c0_0, %c0_1], %16 {strides = array<i32>} : memref<2x2xf32, #tpu.memory_space<vmem>>, vector<2x2xf32>,
    return
  }
  func.func @transform_0(%arg0: i32) -> i32 {
    %c0_i32 = arith.constant 0 : i32
    %c0_i32_0 = arith.constant 0 : i32
    return %c0_i32 : i32
  }
  func.func @transform_1(%arg0: i32) -> (i32, i32) {
    %c0_i32 = arith.constant 0 : i32
    %c0_i32_0 = arith.constant 0 : i32
    return %arg0, %c0_i32 : i32, i32
  }
}

</mosaic_0001>

<bundles_post_ra>
// kernel: tpu_custom_call.1
= control target key start
LH: loop header
LB: loop body
LE: loop exit
PB: predicated region body
PF: predicated region fallthrough
CT: control target
= control target key end

     0   :  { %6 = vsyncpa [#allocation4], 0  ;;  %s120_s0 = inlined_call_operand.hbm [shape: f32[3], index: 0, kind: input, shape index: {}]   ;;  %s121_s1 = inlined_call_operand.hbm [shape: f32[2,2], index: 1, kind: output, shape index: {}]  }
   0x1   :  { %7 = vsyncpa [#allocation3], 0  ;;  %s102_s6 = smov [#allocation2]  }
   0x2   :  { %15 = dma.hbm_to_smem %s120_s0, 16, %s102_s6, [#allocation4]  }
   0x3   :  { %98 = dma.done.wait [#allocation4], 16  }
   0x4   :  { %99 = vsyncadd [#allocation4], 4294967280 }
   0x5   :  { %19 = sfence }
   0x6   :  { %s20_s9 = sld [smem:[#allocation2]]  ;;  %v35_v4 = vlaneseq  ;;  %s103_s18 = smov [#allocation5]   ;;  %vm41_vm1 = vcmask 9216  }
   0x7   :  { %s58_s10 = sld [smem:[#allocation2 + $0x1]]  ;;  %s49_s19 = sshll.u32 %s103_s18, 4  ;;  %s50_s19 = int_to_ptr.vmem [resolvable:$true] %s49_s19 }
   0x8   :  { %s59_s11 = sld [smem:[#allocation2 + $0x2]]  ;;  %v36_v5 = vand.u32 127, %v35_v4  ;;  %s78_s21 = scalar_lea.vmem %s50_s19, 32 }
   0x9   :  { %p79_p0 = scmp.ne.s32.totalorder %s50_s19, %s78_s21  ;;  %p83_p1 = scmp.lt.s32.totalorder %s50_s19, %s50_s19 }
   0xa   :  { %vm37_vm0 = vcmp.eq.s32.totalorder %v36_v5, 0  ;;  %p84_p2 = scmp.lt.s32.totalorder %s78_s21, %s78_s21 }
   0xc   :  { %s23_s12 = smul.f32 %s20_s9, %s20_s9  ;;  %p85_p3 = por %p84_p2, %p83_p1 }
   0xd   :  { %s24_s13 = smul.f32 %s58_s10, %s58_s10 }
   0xe   :  { %v29_v0 = vstv %s59_s11  ;;  %p86_p4 = pnand %p85_p3, %p79_p0 }
   0xf   :  { %s25_s14 = sadd.f32 %s24_s13, %s23_s12  ;;  %66 = vtanh.f32 %v29_v0 }
  0x11   :  { %v26_v1 = vstv %s25_s14 }
  0x12   :  { %68 = vrsqrt.f32 %v26_v1 }
  0x1c   :  { %v67_v2 = vpop.eup %66 }
  0x1f   :  { %v69_v3 = vpop.eup %68 }
  0x20   :  { %60 = vpush %v69_v3 }
  0x21   :  { %62 = vpush %v67_v2 }
  0x51   :  { %s61_s15 = spop %60 }
  0x52   :  { %s63_s0 = spop %62 }
  0x53   :  { %s32_s16 = smul.f32 %s63_s0, %s61_s15 }
  0x55   :  { %s33_s17 = smul.f32 %s32_s16, %s20_s9 }
  0x56   :  { %s34_s20 = smul.f32 %s58_s10, %s32_s16 }
  0x57   :  { %v38_v6 = vstv %s33_s17 }
  0x58   :  { %v39_v7 = vstv %s34_s20 }
  0x59   :  { %v40_v8 = vsel %vm37_vm0, %v38_v6, %v39_v7 }
  0x5a   :  { %42 = vst.msk [vmem:[#allocation5] sm:$0x3] %vm41_vm1, %v40_v8 }
  0x5b   :  { %89 = shalt.err (!%p86_p4)
}
  0x5c   :  { %52 = dma.vmem_to_hbm [thread:$0]  %s50_s19, 32, %s121_s1, [#allocation3]  }
  0x5d   :  { %100 = dma.done.wait [#allocation3], 32  }
  0x5e   :  { %101 = vsyncadd [#allocation3], 4294967264 }
  0x5f   :  { %56 = vsyncpa [#allocation3], 1 }
  0x60   :  { %57 = vsyncpa [#allocation4], 1 }

</bundles_post_ra>
